<compile_context>
chip_gen: v7x
topology: tpu7x:2x2x1
jax: 0.10.0
libtpu: 0.0.40
codegen_flags: <defaults>
</compile_context>

<pallas_src>
import functools

import jax
import jax.numpy as jnp
from jax.experimental import pallas as pl
from jax.experimental.pallas import tpu as pltpu

_LANE = 128
_SUBLANE = 8
_DEFAULT_TILE_B = 4096  # (4096x16 + 4096x4)*4B*2bufs + (4096x128)*4B ~ 3 MiB


def _round_up(x, m):
    return (x + m - 1) // m * m


def _mlp_kernel(x_ref, w1_ref, b1_ref, w2_ref, b2_ref, out_ref):
    # fc1: [TB, in] @ [in, Hp] + [1, Hp] -> ReLU   (Hp = 128, lane-dense)
    h = jnp.dot(x_ref[...], w1_ref[...], preferred_element_type=jnp.float32)
    h = jnp.maximum(h + b1_ref[...], 0.0)
    # fc2: [TB, Hp] @ [Hp, A] + [1, A]             (A = nb_action, narrow store)
    q = jnp.dot(h, w2_ref[...], preferred_element_type=jnp.float32)
    out_ref[...] = (q + b2_ref[...]).astype(out_ref.dtype)


def pad_params(w1_t, b1, w2_t, b2):
    """One-time padding of the hidden dim (30 -> 128). Zero hidden lanes are
    exact: relu(0 + 0) = 0 and the matching zero rows of w2 contribute 0."""
    in_size, hidden = w1_t.shape
    nb_action = w2_t.shape[1]
    h_pad = _round_up(hidden, _LANE)
    w1_p = jnp.zeros((in_size, h_pad), jnp.float32).at[:, :hidden].set(w1_t)
    b1_p = jnp.zeros((1, h_pad), jnp.float32).at[:, :hidden].set(
        b1.reshape(1, hidden))
    w2_p = jnp.zeros((h_pad, nb_action), jnp.float32).at[:hidden, :].set(w2_t)
    b2_p = b2.reshape(1, nb_action).astype(jnp.float32)
    return w1_p, b1_p, w2_p, b2_p


@functools.partial(jax.jit, static_argnames=("tile_b",))
def network_forward(state, w1_p, b1_p, w2_p, b2_p, *, tile_b=_DEFAULT_TILE_B):
    """Pallas equivalent of Network.forward.

    state : [B, input_size] float32
    w1_p  : [input_size, 128] float32   (fc1.weight.T, hidden zero-padded)
    b1_p  : [1, 128] float32            (fc1.bias, zero-padded)
    w2_p  : [128, nb_action] float32    (fc2.weight.T, hidden zero-padded)
    b2_p  : [1, nb_action] float32      (fc2.bias)
    returns q_values : [B, nb_action] float32
    """
    B, in_size = state.shape
    h_pad = w1_p.shape[1]
    nb_action = w2_p.shape[1]

    # Batch tile: big tiles amortize per-step overhead; for small/medium B
    # split into >=2 tiles so v7x megacore sharding ("parallel") engages.
    if B <= tile_b:
        tb = max(_SUBLANE, _round_up(pl.cdiv(B, 2), _SUBLANE))
    else:
        tb = tile_b
    grid = (pl.cdiv(B, tb),)  # ragged last block handled by Pallas

    flops = 2 * B * (in_size * h_pad + h_pad * nb_action)
    bytes_accessed = 4 * (B * in_size + in_size * h_pad + h_pad
                          + h_pad * nb_action + nb_action + B * nb_action)

    return pl.pallas_call(
        _mlp_kernel,
        out_shape=jax.ShapeDtypeStruct((B, nb_action), jnp.float32),
        grid=grid,
        in_specs=[
            pl.BlockSpec((tb, in_size), lambda i: (i, 0)),       # state tile
            pl.BlockSpec((in_size, h_pad), lambda i: (0, 0)),    # fc1.W^T (resident)
            pl.BlockSpec((1, h_pad), lambda i: (0, 0)),          # fc1.b   (resident)
            pl.BlockSpec((h_pad, nb_action), lambda i: (0, 0)),  # fc2.W^T (resident)
            pl.BlockSpec((1, nb_action), lambda i: (0, 0)),      # fc2.b   (resident)
        ],
        out_specs=pl.BlockSpec((tb, nb_action), lambda i: (i, 0)),
        compiler_params=pltpu.CompilerParams(
            dimension_semantics=("parallel",)),  # megacore on v7x, no-op v5e/v6e
        cost_estimate=pl.CostEstimate(
            flops=flops, transcendentals=0, bytes_accessed=bytes_accessed),
    )(state, w1_p, b1_p, w2_p, b2_p)


def network_apply(state, padded_params, *, pallas_min_batch=1024):
    """Dispatch: below ~1K rows the whole problem is a few KB and the fused
    XLA dot path is at least as fast as paying custom-kernel fixed costs."""
    w1_p, b1_p, w2_p, b2_p = padded_params
    if state.shape[0] < pallas_min_batch:
        return jnp.maximum(state @ w1_p + b1_p, 0.0) @ w2_p + b2_p
    return network_forward(state, w1_p, b1_p, w2_p, b2_p)


def init_params(key, input_size, nb_action, hidden=30):
    """Deterministic init mimicking nn.Linear's U(-1/sqrt(fan_in), ...).
    Weights returned already transposed as [in, out]."""
    k1, k2, k3, k4 = jax.random.split(key, 4)
    bound1 = 1.0 / jnp.sqrt(jnp.float32(input_size))
    bound2 = 1.0 / jnp.sqrt(jnp.float32(hidden))
    w1_t = jax.random.uniform(k1, (input_size, hidden), jnp.float32, -bound1, bound1)
    b1 = jax.random.uniform(k2, (hidden,), jnp.float32, -bound1, bound1)
    w2_t = jax.random.uniform(k3, (hidden, nb_action), jnp.float32, -bound2, bound2)
    b2 = jax.random.uniform(k4, (nb_action,), jnp.float32, -bound2, bound2)
    return w1_t, b1, w2_t, b2


if __name__ == "__main__":
    key = jax.random.PRNGKey(0)
    k_params, k_state, k_state2 = jax.random.split(key, 3)

    input_size = 16
    nb_action = 4
    batch = 8

    w1_t, b1, w2_t, b2 = init_params(k_params, input_size, nb_action)
    padded = pad_params(w1_t, b1, w2_t, b2)

    def ref_fwd(s):
        return jnp.maximum(s @ w1_t + b1.reshape(1, -1), 0.0) @ w2_t \
            + b2.reshape(1, -1)

    # Small batch: exercise the Pallas kernel directly.
    state = jax.random.normal(k_state, (batch, input_size), jnp.float32)
    q_values = jax.block_until_ready(network_forward(state, *padded))
    assert q_values.shape == (batch, nb_action)
    assert jnp.allclose(q_values, ref_fwd(state), atol=1e-5, rtol=1e-5)

    # Larger batch: exercises a multi-step grid with a ragged last block.
    state2 = jax.random.normal(k_state2, (200, input_size), jnp.float32)
    q2 = jax.block_until_ready(network_forward(state2, *padded))
    assert q2.shape == (200, nb_action)
    assert jnp.allclose(q2, ref_fwd(state2), atol=1e-4, rtol=1e-4)

    print("KERNEL_OK")
</pallas_src>

<mosaic_0001>
module attributes {stable_mosaic.version = 11 : i64} {
  func.func @_mlp_kernel(%arg0: i32, %arg1: memref<8x16xf32, #tpu.memory_space<vmem>>, %arg2: memref<16x128xf32, #tpu.memory_space<vmem>>, %arg3: memref<1x128xf32, #tpu.memory_space<vmem>>, %arg4: memref<128x4xf32, #tpu.memory_space<vmem>>, %arg5: memref<1x4xf32, #tpu.memory_space<vmem>>, %arg6: memref<8x4xf32, #tpu.memory_space<vmem>>) attributes {dimension_semantics = [#tpu.dimension_semantics<parallel>], iteration_bounds = array<i64: 1>, scalar_prefetch = 0 : i64, scratch_operands = 0 : i64, tpu.core_type = #tpu.core_type<tc>, window_params = [{transform_indices = @transform_0, window_bounds = array<i64: 8, 16>}, {pipeline_mode = #tpu.pipeline_mode<synchronous>, transform_indices = @transform_1, window_bounds = array<i64: 16, 128>}, {pipeline_mode = #tpu.pipeline_mode<synchronous>, transform_indices = @transform_2, window_bounds = array<i64: 1, 128>}, {pipeline_mode = #tpu.pipeline_mode<synchronous>, transform_indices = @transform_3, window_bounds = array<i64: 128, 4>}, {pipeline_mode = #tpu.pipeline_mode<synchronous>, transform_indices = @transform_4, window_bounds = array<i64: 1, 4>}, {transform_indices = @transform_5, window_bounds = array<i64: 8, 4>}]} {
    %c0 = arith.constant 0 : index
    %c0_0 = arith.constant 0 : index
    %0 = vector.load %arg1[%c0, %c0_0] : memref<8x16xf32, #tpu.memory_space<vmem>>, vector<8x16xf32>
    %c0_1 = arith.constant 0 : index
    %c0_2 = arith.constant 0 : index
    %1 = vector.load %arg2[%c0_1, %c0_2] : memref<16x128xf32, #tpu.memory_space<vmem>>, vector<16x128xf32>
    %cst = arith.constant dense<0.000000e+00> : vector<8x128xf32>
    %2 = tpu.matmul %0, %1, %cst {dimension_numbers = #tpu.dot_dimension_numbers<[1], [0], [0], [1], [0, 0, 1, 1], [], []>} : vector<8x16xf32>, vector<16x128xf32>, vector<8x128xf32> -> vector<8x128xf32>
    %c0_3 = arith.constant 0 : index
    %c0_4 = arith.constant 0 : index
    %3 = vector.load %arg3[%c0_3, %c0_4] : memref<1x128xf32, #tpu.memory_space<vmem>>, vector<1x128xf32>
    %4 = vector.broadcast %3 : vector<1x128xf32> to vector<8x128xf32>
    %5 = arith.addf %2, %4 : vector<8x128xf32>
    %cst_5 = arith.constant 0.000000e+00 : f32
    %6 = vector.broadcast %cst_5 : f32 to vector<8x128xf32>
    %7 = arith.maximumf %5, %6 : vector<8x128xf32>
    %c0_6 = arith.constant 0 : index
    %c0_7 = arith.constant 0 : index
    %8 = vector.load %arg4[%c0_6, %c0_7] : memref<128x4xf32, #tpu.memory_space<vmem>>, vector<128x4xf32>
    %cst_8 = arith.constant dense<0.000000e+00> : vector<8x4xf32>
    %9 = tpu.matmul %7, %8, %cst_8 {dimension_numbers = #tpu.dot_dimension_numbers<[1], [0], [0], [1], [0, 0, 1, 1], [], []>} : vector<8x128xf32>, vector<128x4xf32>, vector<8x4xf32> -> vector<8x4xf32>
    %c0_9 = arith.constant 0 : index
    %c0_10 = arith.constant 0 : index
    %10 = vector.load %arg5[%c0_9, %c0_10] : memref<1x4xf32, #tpu.memory_space<vmem>>, vector<1x4xf32>
    %11 = vector.broadcast %10 : vector<1x4xf32> to vector<8x4xf32>
    %12 = arith.addf %9, %11 : vector<8x4xf32>
    %c0_11 = arith.constant 0 : index
    %c0_12 = arith.constant 0 : index
    %13 = vector.load %arg6[%c0_11, %c0_12] : memref<8x4xf32, #tpu.memory_space<vmem>>, vector<8x4xf32>
    tpu.vector_store %arg6[%c0_11, %c0_12], %12 {strides = array<i32>} : memref<8x4xf32, #tpu.memory_space<vmem>>, vector<8x4xf32>,
    return
  }
  func.func @transform_0(%arg0: i32) -> (i32, i32) {
    %c0_i32 = arith.constant 0 : i32
    %c0_i32_0 = arith.constant 0 : i32
    return %arg0, %c0_i32 : i32, i32
  }
  func.func @transform_1(%arg0: i32) -> (i32, i32) {
    %c0_i32 = arith.constant 0 : i32
    %c0_i32_0 = arith.constant 0 : i32
    %c0_i32_1 = arith.constant 0 : i32
    return %c0_i32, %c0_i32_0 : i32, i32
  }
  func.func @transform_2(%arg0: i32) -> (i32, i32) {
    %c0_i32 = arith.constant 0 : i32
    %c0_i32_0 = arith.constant 0 : i32
    %c0_i32_1 = arith.constant 0 : i32
    return %c0_i32, %c0_i32_0 : i32, i32
  }
  func.func @transform_3(%arg0: i32) -> (i32, i32) {
    %c0_i32 = arith.constant 0 : i32
    %c0_i32_0 = arith.constant 0 : i32
    %c0_i32_1 = arith.constant 0 : i32
    return %c0_i32, %c0_i32_0 : i32, i32
  }
  func.func @transform_4(%arg0: i32) -> (i32, i32) {
    %c0_i32 = arith.constant 0 : i32
    %c0_i32_0 = arith.constant 0 : i32
    %c0_i32_1 = arith.constant 0 : i32
    return %c0_i32, %c0_i32_0 : i32, i32
  }
  func.func @transform_5(%arg0: i32) -> (i32, i32) {
    %c0_i32 = arith.constant 0 : i32
    %c0_i32_0 = arith.constant 0 : i32
    return %arg0, %c0_i32 : i32, i32
  }
}

</mosaic_0001>

<bundles_post_ra>
// kernel: network_forward.1
= control target key start
LH: loop header
LB: loop body
LE: loop exit
PB: predicated region body
PF: predicated region fallthrough
CT: control target
= control target key end

     0   :  { %v299_v0 = vmov 0.0|0.0   ;;  %vm300_vm0 = vmmov 0   ;;  %v301_v3 = vmov 0.0   ;;  %vm30_vm1 = vcmask 130048   ;;  %s398_s1 = inlined_call_operand.vmem [shape: f32[16,128], index: 1, kind: input, shape index: {}]   ;;  %s399_s3 = inlined_call_operand.vmem [shape: f32[128,4], index: 3, kind: input, shape index: {}]   ;;  %s400_s0 = inlined_call_operand.vmem [shape: f32[8,16], index: 0, kind: input, shape index: {}]   ;;  %s401_s2 = inlined_call_operand.vmem [shape: f32[1,128], index: 2, kind: input, shape index: {}]   ;;  %s402_s4 = inlined_call_operand.vmem [shape: f32[1,4], index: 4, kind: input, shape index: {}]   ;;  %s403_s5 = inlined_call_operand.vmem [shape: f32[8,4], index: 5, kind: output, shape index: {}]  }
   0x1   :  { %269 = vmatprep.subr.bf16.mxu0 %v299_v0  ;;  %v21_v1 = vld [vmem:[%s398_s1] sm:$0xff]  ;;  %v22_v2 = vld [vmem:[%s398_s1 + $0x8] sm:$0xff]  ;;  %231 = vmatprep.mubr.msk.f32.mxu0 %vm300_vm0, %v301_v3  ;;  %v107_v7 = vld [vmem:[%s399_s3 + $0x10] sm:$0xff]  ;;  %vm198_vm2 = vcmask 31744  }
   0x2   :  { %v270_v4 = vpack.c.bf16 %v22_v2, %v21_v1  ;;  %272 = vmatprep.subr.bf16.mxu1 %v299_v0  ;;  %v105_v5 = vld [vmem:[%s399_s3] sm:$0xff]  ;;  %v106_v6 = vld [vmem:[%s399_s3 + $0x8] sm:$0xff]  ;;  %266 = vmatprep.mubr.msk.f32.mxu1 %vm300_vm0, %v301_v3  ;;  %v108_v9 = vld [vmem:[%s399_s3 + $0x18] sm:$0xff] }
   0x3   :  { %v273_v8 = vpack.c.bf16 %v106_v6, %v105_v5  ;;  %v20_v10 = vld [vmem:[%s400_s0] sm:$0xff]  ;;  %v276_v11 = vpack.c.bf16 %v108_v9, %v107_v7  ;;  %v110_v13 = vld [vmem:[%s399_s3 + $0x28] sm:$0xff]  ;;  %v111_v15 = vld [vmem:[%s399_s3 + $0x30] sm:$0xff] }
   0x4   :  { %271 = vmatpush3.bf16.msra.mxu0 %v270_v4  ;;  %v109_v12 = vld [vmem:[%s399_s3 + $0x20] sm:$0xff]  ;;  %v112_v16 = vld [vmem:[%s399_s3 + $0x38] sm:$0xff]  ;;  %v114_v19 = vld [vmem:[%s399_s3 + $0x48] sm:$0xff] }
   0x5   :  { %274 = vmatpush3.bf16.msra.mxu1 %v273_v8  ;;  %v279_v14 = vpack.c.bf16 %v110_v13, %v109_v12  ;;  %v282_v17 = vpack.c.bf16 %v112_v16, %v111_v15  ;;  %v113_v18 = vld [vmem:[%s399_s3 + $0x40] sm:$0xff]  ;;  %v115_v21 = vld [vmem:[%s399_s3 + $0x50] sm:$0xff]  ;;  %v116_v22 = vld [vmem:[%s399_s3 + $0x58] sm:$0xff] }
   0x6   :  { %275 = vmatprep.subr.bf16.mxu1 %v299_v0  ;;  %v285_v20 = vpack.c.bf16 %v114_v19, %v113_v18  ;;  %v288_v23 = vpack.c.bf16 %v116_v22, %v115_v21  ;;  %v117_v24 = vld [vmem:[%s399_s3 + $0x60] sm:$0xff]  ;;  %v118_v25 = vld [vmem:[%s399_s3 + $0x68] sm:$0xff]  ;;  %v119_v27 = vld [vmem:[%s399_s3 + $0x70] sm:$0xff] }
   0x7   :  { %232 = vmatmul.mubr.msk.f32.vlgmr.msra.gmra.mrb[0].mxu0 %vm30_vm1, %v20_v10  ;;  %v291_v26 = vpack.c.bf16 %v118_v25, %v117_v24  ;;  %v120_v28 = vld [vmem:[%s399_s3 + $0x78] sm:$0xff]  ;;  %v204_v30 = vld [vmem:[%s401_s2] ss:$0 sm:$0xff] }
   0x8   :  { %v294_v29 = vpack.c.bf16 %v120_v28, %v119_v27  ;;  %v206_v35 = vld [vmem:[%s402_s4] ss:$0 sm:$0xff] }
   0x9   :  { %277 = vmatpush3.bf16.msra.mxu1 %v276_v11 }
   0xa   :  { %278 = vmatprep.subr.bf16.mxu1 %v299_v0 }
   0xd   :  { %280 = vmatpush3.bf16.msra.mxu1 %v279_v14 }
   0xe   :  { %281 = vmatprep.subr.bf16.mxu1 %v299_v0 }
  0x11   :  { %283 = vmatpush3.bf16.msra.mxu1 %v282_v17 }
  0x12   :  { %284 = vmatprep.subr.bf16.mxu1 %v299_v0 }
  0x15   :  { %286 = vmatpush3.bf16.msra.mxu1 %v285_v20 }
  0x16   :  { %287 = vmatprep.subr.bf16.mxu1 %v299_v0 }
  0x19   :  { %289 = vmatpush3.bf16.msra.mxu1 %v288_v23 }
  0x1a   :  { %290 = vmatprep.subr.bf16.mxu1 %v299_v0 }
  0x1d   :  { %292 = vmatpush3.bf16.msra.mxu1 %v291_v26 }
  0x1e   :  { %293 = vmatprep.subr.bf16.mxu1 %v299_v0 }
  0x21   :  { %295 = vmatpush3.bf16.msra.mxu1 %v294_v29 }
  0xda   :  { %v100_v31 = vpop.f32.mrb[0].mxu0 }
  0xdb   :  { %v101_v32 = vadd.f32 %v204_v30, %v100_v31  ;;  %v233_v33 = vpop.f32.mrb[1].mxu0 }
  0xdd   :  { %v104_v34 = vmax.f32 %v101_v32, 0.0 }
  0xdf   :  { %267 = vmatmul.mubr.f32.vlgmr.msra.gmra.mrb[0].mxu1 %v104_v34 }
 0x1b2   :  { %v194_v36 = vpop.f32.mrb[0].mxu1 }
 0x1b3   :  { %v195_v37 = vadd.f32 %v206_v35, %v194_v36  ;;  %v268_v38 = vpop.f32.mrb[1].mxu1 }
 0x1b5   :  { %199 = vst.msk [vmem:[%s403_s5] sm:$0xff] %vm198_vm2, %v195_v37 }

</bundles_post_ra>
